<compile_context>
chip_gen: v7x
topology: tpu7x:2x2x1
jax: 0.10.0
libtpu: 0.0.40
codegen_flags: <defaults>
</compile_context>

<pallas_src>
import jax
import jax.numpy as jnp
from jax.experimental import pallas as pl
from jax.experimental.pallas import tpu as pltpu

LANE = 128


def _round_up(v, m):
    return (v + m - 1) // m * m


def _cdiv(a, b):
    return -(-a // b)


def _make_kernel(TB, S, K, L, E, KE_pad, F_pad):
    """Kernel for one batch tile: conv1d + bias + ReLU + global max-pool."""
    M = TB * S

    def kernel(x_ref, w_ref, b_ref, o_ref):
        # x_ref: (M, E) f32   w_ref: (KE_pad, F_pad) f32
        # b_ref: (1, F_pad) f32   o_ref: (TB, F_pad) f32
        x = x_ref[...]                                           # (M, E)

        # --- im2col in VMEM: one lane-dense (M, KE_pad) block ----------------
        cols = [x]
        for j in range(1, K):
            # Rows shifted up by j; the j zero tail rows only ever feed time
            # positions t >= L, which are masked out of the max below.
            cols.append(jnp.concatenate(
                [x[j:, :], jnp.zeros((j, E), dtype=x.dtype)], axis=0))
        if KE_pad > K * E:
            cols.append(jnp.zeros((M, KE_pad - K * E), dtype=x.dtype))
        patches = jnp.concatenate(cols, axis=1)                  # (M, KE_pad)

        # --- one deep MXU matmul, f32 accumulation + epilogue ----------------
        acc = jnp.dot(patches, w_ref[...],
                      preferred_element_type=jnp.float32)        # (M, F_pad)
        relu = jnp.maximum(acc + b_ref[...], 0.0)

        # --- global max-pool over the L valid positions, fully vectorized ----
        r3 = relu.reshape(TB, S, F_pad)
        t = jax.lax.broadcasted_iota(jnp.int32, (TB, S, F_pad), 1)
        masked = jnp.where(t < L, r3, -jnp.inf)
        o_ref[...] = jnp.max(masked, axis=1).astype(o_ref.dtype)

    return kernel


def _choose_batch_tiling(B, S, E, KE_pad, F_pad, max_batch_tile=None):
    """Pick (TB, B_pad, grid_b) from a VMEM budget instead of a fixed tile."""
    # Conservative per-batch-element VMEM working set (f32 bytes): double-
    # buffered x block, im2col patches + shifted copies, acc/relu/mask temps.
    per_b = 4 * S * (2 * E + 2 * KE_pad + 4 * F_pad)
    budget = 8 * 1024 * 1024          # comfortably below v7x's 64 MiB physical
    tb_cap = max(8, budget // per_b)
    tb_cap = min(tb_cap, max(8, 2048 // S))   # keep the (M, F_pad) acc modest
    if max_batch_tile is not None:
        tb_cap = min(tb_cap, max_batch_tile)
    if B <= tb_cap:
        # Single VMEM-resident invocation: blocks == full arrays, no padding.
        return B, B, 1
    # Even number of tiles (keeps both v7x TensorCores busy); TB multiple of 8
    # so tiled blocks satisfy the (8, 128) alignment rule.
    grid_b = 2 * _cdiv(B, 2 * tb_cap)
    TB = _round_up(_cdiv(B, grid_b), 8)
    return TB, TB * grid_b, grid_b


def cnn_forward(x, weight, bias, kernel_size, max_batch_tile=None):
    """
    x:      (B, sent_len, embed_dim)              float32
    weight: (num_filter, embed_dim, kernel_size)  PyTorch Conv1d layout
    bias:   (num_filter,)
    returns (B, num_filter)  == CNN.forward(x)
    """
    B, S, E = x.shape
    F_out, E_w, K = weight.shape
    assert K == kernel_size and E_w == E
    L = S - K + 1
    assert L >= 1, "sent_len must be >= kernel_size"

    F_pad = _round_up(F_out, LANE)
    KE_pad = _round_up(K * E, LANE)

    # PyTorch Conv1d weight (F, E, K) -> one (KE_pad, F_pad) matrix so the K
    # taps fold into a single MXU contraction:  w_big[j*E + c, f] = w[f, c, j].
    w_big = jnp.transpose(weight, (2, 1, 0)).reshape(K * E, F_out)
    w_big = jnp.pad(w_big, ((0, KE_pad - K * E), (0, F_pad - F_out)))
    w_big = w_big.astype(jnp.float32)
    b_pad = jnp.pad(bias, (0, F_pad - F_out)).reshape(1, F_pad).astype(jnp.float32)

    TB, B_pad, grid_b = _choose_batch_tiling(B, S, E, KE_pad, F_pad,
                                             max_batch_tile)
    if B_pad != B:
        x = jnp.pad(x, ((0, B_pad - B), (0, 0), (0, 0)))
    x2d = x.reshape(B_pad * S, E)                      # free reshape in HBM
    M = TB * S

    kernel = _make_kernel(TB, S, K, L, E, KE_pad, F_pad)

    # --- cost / VMEM hints ----------------------------------------------------
    flops = 2 * grid_b * M * KE_pad * F_pad
    bytes_accessed = int(4 * (x2d.size + w_big.size + b_pad.size + B_pad * F_pad))
    vmem_need = 4 * (2 * (M * E + TB * F_pad)          # double-buffered x / out
                     + 2 * (KE_pad * F_pad + F_pad)    # weights + bias (buffered)
                     + (K + 1) * M * E + M * KE_pad    # shifted copies + patches
                     + 3 * M * F_pad)                  # acc / relu / mask temps
    vmem_limit = int(min(48 * 1024 * 1024, max(4 * 1024 * 1024, 2 * vmem_need)))

    out = pl.pallas_call(
        kernel,
        out_shape=jax.ShapeDtypeStruct((B_pad, F_pad), jnp.float32),
        grid=(grid_b,),
        in_specs=[
            pl.BlockSpec((M, E), lambda i: (i, 0)),
            pl.BlockSpec((KE_pad, F_pad), lambda i: (0, 0)),
            pl.BlockSpec((1, F_pad), lambda i: (0, 0)),
        ],
        out_specs=pl.BlockSpec((TB, F_pad), lambda i: (i, 0)),
        compiler_params=pltpu.CompilerParams(
            dimension_semantics=("parallel",),
            vmem_limit_bytes=vmem_limit),
        cost_estimate=pl.CostEstimate(flops=flops, transcendentals=0,
                                      bytes_accessed=bytes_accessed),
    )(x2d, w_big, b_pad)

    return out[:B, :F_out]


def cnn_reference(x, weight, bias, kernel_size):
    """Pure-JAX reference of the PyTorch forward."""
    B, S, E = x.shape
    L = S - kernel_size + 1
    idx = jnp.arange(L)[:, None] + jnp.arange(kernel_size)[None, :]   # (L, K)
    patches = x[:, idx, :]                                            # (B, L, K, E)
    conv = jnp.einsum("blke,fek->blf", patches, weight) + bias[None, None, :]
    return jnp.max(jnp.maximum(conv, 0.0), axis=1)                    # (B, F)


if __name__ == "__main__":
    key = jax.random.PRNGKey(0)
    kx, kw, kb, kx2 = jax.random.split(key, 4)

    batch, sent_len, embed_dim = 2, 16, 32
    kernel_size, num_filter = 3, 16

    x = jax.random.normal(kx, (batch, sent_len, embed_dim), dtype=jnp.float32)
    weight = jax.random.normal(
        kw, (num_filter, embed_dim, kernel_size), dtype=jnp.float32) * 0.1
    bias = jax.random.normal(kb, (num_filter,), dtype=jnp.float32) * 0.1

    out = jax.block_until_ready(cnn_forward(x, weight, bias, kernel_size))
    ref = cnn_reference(x, weight, bias, kernel_size)
    assert out.shape == (batch, num_filter), out.shape
    assert jnp.allclose(out, ref, atol=1e-4, rtol=1e-4), (out, ref)

    # Larger batch: still a single VMEM-resident invocation (grid_b = 1).
    batch2 = 20
    x2 = jax.random.normal(kx2, (batch2, sent_len, embed_dim), dtype=jnp.float32)
    out2 = jax.block_until_ready(cnn_forward(x2, weight, bias, kernel_size))
    ref2 = cnn_reference(x2, weight, bias, kernel_size)
    assert out2.shape == (batch2, num_filter), out2.shape
    assert jnp.allclose(out2, ref2, atol=1e-4, rtol=1e-4), (out2, ref2)

    # Force the multi-tile "parallel" grid path (even grid, batch padding, 8-row
    # aligned tiles) to exercise the large-batch tiling as well.
    out3 = jax.block_until_ready(
        cnn_forward(x2, weight, bias, kernel_size, max_batch_tile=8))
    assert out3.shape == (batch2, num_filter), out3.shape
    assert jnp.allclose(out3, ref2, atol=1e-4, rtol=1e-4), (out3, ref2)

    print("KERNEL_OK")
</pallas_src>

<mosaic_0001>
module attributes {stable_mosaic.version = 11 : i64} {
  func.func @kernel(%arg0: i32, %arg1: memref<32x32xf32, #tpu.memory_space<vmem>>, %arg2: memref<128x128xf32, #tpu.memory_space<vmem>>, %arg3: memref<1x128xf32, #tpu.memory_space<vmem>>, %arg4: memref<2x128xf32, #tpu.memory_space<vmem>>) attributes {dimension_semantics = [#tpu.dimension_semantics<parallel>], iteration_bounds = array<i64: 1>, scalar_prefetch = 0 : i64, scratch_operands = 0 : i64, tpu.core_type = #tpu.core_type<tc>, window_params = [{transform_indices = @transform_0, window_bounds = array<i64: 32, 32>}, {pipeline_mode = #tpu.pipeline_mode<synchronous>, transform_indices = @transform_1, window_bounds = array<i64: 128, 128>}, {pipeline_mode = #tpu.pipeline_mode<synchronous>, transform_indices = @transform_2, window_bounds = array<i64: 1, 128>}, {transform_indices = @transform_3, window_bounds = array<i64: 2, 128>}]} {
    %c0 = arith.constant 0 : index
    %c0_0 = arith.constant 0 : index
    %0 = vector.load %arg1[%c0, %c0_0] : memref<32x32xf32, #tpu.memory_space<vmem>>, vector<32x32xf32>
    %1 = vector.extract_strided_slice %0 {offsets = [1, 0], sizes = [31, 32], strides = [1, 1]} : vector<32x32xf32> to vector<31x32xf32>
    %cst = arith.constant 0.000000e+00 : f32
    %2 = vector.broadcast %cst : f32 to vector<1x32xf32>
    %3 = tpu.concatenate %1, %2 in 0 : vector<31x32xf32>, vector<1x32xf32> -> vector<32x32xf32>
    %4 = vector.extract_strided_slice %0 {offsets = [2, 0], sizes = [30, 32], strides = [1, 1]} : vector<32x32xf32> to vector<30x32xf32>
    %cst_1 = arith.constant 0.000000e+00 : f32
    %5 = vector.broadcast %cst_1 : f32 to vector<2x32xf32>
    %6 = tpu.concatenate %4, %5 in 0 : vector<30x32xf32>, vector<2x32xf32> -> vector<32x32xf32>
    %cst_2 = arith.constant 0.000000e+00 : f32
    %7 = vector.broadcast %cst_2 : f32 to vector<32x32xf32>
    %8 = tpu.concatenate %0, %3, %6, %7 in 1 : vector<32x32xf32>, vector<32x32xf32>, vector<32x32xf32>, vector<32x32xf32> -> vector<32x128xf32>
    %c0_3 = arith.constant 0 : index
    %c0_4 = arith.constant 0 : index
    %9 = vector.load %arg2[%c0_3, %c0_4] : memref<128x128xf32, #tpu.memory_space<vmem>>, vector<128x128xf32>
    %cst_5 = arith.constant dense<0.000000e+00> : vector<32x128xf32>
    %10 = tpu.matmul %8, %9, %cst_5 {dimension_numbers = #tpu.dot_dimension_numbers<[1], [0], [0], [1], [0, 0, 1, 1], [], []>} : vector<32x128xf32>, vector<128x128xf32>, vector<32x128xf32> -> vector<32x128xf32>
    %c0_6 = arith.constant 0 : index
    %c0_7 = arith.constant 0 : index
    %11 = vector.load %arg3[%c0_6, %c0_7] : memref<1x128xf32, #tpu.memory_space<vmem>>, vector<1x128xf32>
    %12 = vector.broadcast %11 : vector<1x128xf32> to vector<32x128xf32>
    %13 = arith.addf %10, %12 : vector<32x128xf32>
    %cst_8 = arith.constant 0.000000e+00 : f32
    %14 = vector.broadcast %cst_8 : f32 to vector<32x128xf32>
    %15 = arith.maximumf %13, %14 : vector<32x128xf32>
    %16 = vector.shape_cast %15 : vector<32x128xf32> to vector<2x16x128xf32>
    %17 = tpu.iota {dimensions = array<i32: 1>} : vector<2x16x128xi32>
    %c14_i32 = arith.constant 14 : i32
    %18 = vector.broadcast %c14_i32 : i32 to vector<2x16x128xi32>
    %19 = arith.cmpi slt, %17, %18 : vector<2x16x128xi32>
    %cst_9 = arith.constant 0xFF800000 : f32
    %20 = vector.broadcast %cst_9 : f32 to vector<2x16x128xf32>
    %21 = arith.select %19, %16, %20 : vector<2x16x128xi1>, vector<2x16x128xf32>
    %cst_10 = arith.constant dense<0xFF800000> : vector<2x128xf32>
    %22 = vector.multi_reduction <maximumf>, %21, %cst_10 [1] : vector<2x16x128xf32> to vector<2x128xf32>
    %c0_11 = arith.constant 0 : index
    %c0_12 = arith.constant 0 : index
    %23 = vector.load %arg4[%c0_11, %c0_12] : memref<2x128xf32, #tpu.memory_space<vmem>>, vector<2x128xf32>
    tpu.vector_store %arg4[%c0_11, %c0_12], %22 {strides = array<i32>} : memref<2x128xf32, #tpu.memory_space<vmem>>, vector<2x128xf32>,
    return
  }
  func.func @transform_0(%arg0: i32) -> (i32, i32) {
    %c0_i32 = arith.constant 0 : i32
    %c0_i32_0 = arith.constant 0 : i32
    return %arg0, %c0_i32 : i32, i32
  }
  func.func @transform_1(%arg0: i32) -> (i32, i32) {
    %c0_i32 = arith.constant 0 : i32
    %c0_i32_0 = arith.constant 0 : i32
    %c0_i32_1 = arith.constant 0 : i32
    return %c0_i32, %c0_i32_0 : i32, i32
  }
  func.func @transform_2(%arg0: i32) -> (i32, i32) {
    %c0_i32 = arith.constant 0 : i32
    %c0_i32_0 = arith.constant 0 : i32
    %c0_i32_1 = arith.constant 0 : i32
    return %c0_i32, %c0_i32_0 : i32, i32
  }
  func.func @transform_3(%arg0: i32) -> (i32, i32) {
    %c0_i32 = arith.constant 0 : i32
    %c0_i32_0 = arith.constant 0 : i32
    return %arg0, %c0_i32 : i32, i32
  }
}

</mosaic_0001>

<bundles_post_ra>
// kernel: tpu_custom_call.1
= control target key start
LH: loop header
LB: loop body
LE: loop exit
PB: predicated region body
PF: predicated region fallthrough
CT: control target
= control target key end

     0   :  { %8 = vsyncpa [#allocation3], 0  ;;  %s557_s0 = inlined_call_operand.hbm [shape: f32[32,32], index: 0, kind: input, shape index: {}]   ;;  %s558_s1 = inlined_call_operand.hbm [shape: f32[128,128], index: 1, kind: input, shape index: {}]   ;;  %s559_s2 = inlined_call_operand.vmem [shape: f32[1,128], index: 2, kind: input, shape index: {}]   ;;  %s560_s3 = inlined_call_operand.hbm [shape: f32[2,128], index: 3, kind: output, shape index: {}]  }
   0x1   :  { %9 = vsyncpa [#allocation6], 0 }
   0x2   :  { %10 = vsyncpa [#allocation4], 0  ;;  %s459_s12 = smov [#allocation2]   ;;  %s387_s16 = scalar_lea.hbm %s557_s0, 512 }
   0x3   :  { %s16_s13 = sshll.u32 %s459_s12, 4  ;;  %p388_p0 = scmp.ne.s32.totalorder %s557_s0, %s387_s16  ;;  %s17_s13 = int_to_ptr.vmem [resolvable:$true] %s16_s13 }
   0x4   :  { %p391_p1 = scmp.lt.u32.totalorder %s387_s16, %s557_s0 }
   0x6   :  { %p393_p2 = pnand %p391_p1, %p388_p0 }
   0x8   :  { %396 = shalt.err (!%p393_p2)
}
   0x9   :  { %s397_s21 = scalar_lea.vmem %s17_s13, 512  ;;  %p402_p4 = scmp.lt.s32.totalorder %s17_s13, %s17_s13 }
   0xa   :  { %p398_p3 = scmp.ne.s32.totalorder %s17_s13, %s397_s21  ;;  %p403_p5 = scmp.lt.s32.totalorder %s397_s21, %s397_s21 }
   0xc   :  { %p404_p6 = por %p403_p5, %p402_p4 }
   0xe   :  { %p405_p7 = pnand %p404_p6, %p398_p3 }
  0x10   :  { %408 = shalt.err (!%p405_p7)
}
  0x11   :  { %s460_s22 = smov 128   ;;  %s461_s23 = smov 8  }
  0x12   :  { %22 = dma.hbm_to_vmem [thread:$0]  %s557_s0, 512, %s17_s13, [#allocation3], %s460_s22, %s460_s22, %s461_s23  }
  0x13   :  { %s462_s26 = smov [#allocation5]   ;;  %s409_s30 = scalar_lea.hbm %s558_s1, 2048 }
  0x14   :  { %s28_s27 = sshll.u32 %s462_s26, 4  ;;  %p410_p8 = scmp.ne.s32.totalorder %s558_s1, %s409_s30  ;;  %s29_s27 = int_to_ptr.vmem [resolvable:$true] %s28_s27 }
  0x15   :  { %p413_p9 = scmp.lt.u32.totalorder %s409_s30, %s558_s1 }
  0x17   :  { %p415_p10 = pnand %p413_p9, %p410_p8 }
  0x19   :  { %418 = shalt.err (!%p415_p10)
}
  0x1a   :  { %s419_s8 = scalar_lea.vmem %s29_s27, 2048  ;;  %p424_p12 = scmp.lt.s32.totalorder %s29_s27, %s29_s27 }
  0x1b   :  { %p420_p11 = scmp.ne.s32.totalorder %s29_s27, %s419_s8  ;;  %p425_p13 = scmp.lt.s32.totalorder %s419_s8, %s419_s8 }
  0x1d   :  { %p426_p0 = por %p425_p13, %p424_p12 }
  0x1f   :  { %p427_p1 = pnand %p426_p0, %p420_p11 }
  0x21   :  { %430 = shalt.err (!%p427_p1)
}
  0x22   :  { %34 = dma.hbm_to_vmem [thread:$0]  %s558_s1, 2048, %s29_s27, [#allocation6], %s460_s22, %s460_s22, %s461_s23  }
  0x23   :  { %453 = dma.done.wait [#allocation3], 512  }
  0x24   :  { %454 = vsyncadd [#allocation3], 4294966784 }
  0x25   :  { %455 = dma.done.wait [#allocation6], 2048  }
  0x26   :  { %456 = vsyncadd [#allocation6], 4294965248  ;;  %v510_v0 = vld [vmem:[#allocation2 + $0x8] sm:$0xff]  ;;  %v512_v1 = vld [vmem:[#allocation2 + $0x10] sm:$0xff]  ;;  %vm51_vm0 = vcmask 1046528   ;;  %s463_s1 = smov 32   ;;  %v224_v60 = vlaneseq }
  0x27   :  { %v514_v2 = vld [vmem:[#allocation2] sm:$0xff]  ;;  %v53_v3 = vrot.slane %v510_v0, 1  ;;  %v55_v4 = vrot.slane %v512_v1, 1  ;;  %v519_v6 = vld [vmem:[#allocation2 + $0x18] sm:$0xff]  ;;  %v113_v9 = vld [vmem:[#allocation5 + $0x8] sm:$0xff]  ;;  %v65_v15 = vrot.slane %v512_v1, 2 }
  0x28   :  { %v52_v5 = vrot.slane %v514_v2, 1  ;;  %v112_v7 = vld [vmem:[#allocation5] sm:$0xff]  ;;  %v57_v8 = vrot.slane %v519_v6, 1  ;;  %v114_v10 = vld [vmem:[#allocation5 + $0x10] sm:$0xff]  ;;  %v115_v14 = vld [vmem:[#allocation5 + $0x18] sm:$0xff]  ;;  %v67_v16 = vrot.slane %v519_v6, 2 }
  0x29   :  { %v56_v11 = vsel %vm51_vm0, %v53_v3, %v55_v4  ;;  %v332_v13 = vpack.c.bf16 %v113_v9, %v112_v7  ;;  %v62_v17 = vrot.slane %v514_v2, 2  ;;  %v116_v18 = vld [vmem:[#allocation5 + $0x20] sm:$0xff]  ;;  %v117_v19 = vld [vmem:[#allocation5 + $0x28] sm:$0xff]  ;;  %v63_v22 = vrot.slane %v510_v0, 2  ;;  %v118_v25 = vld [vmem:[#allocation5 + $0x30] sm:$0xff]  ;;  %s464_s10 = smov 64  }
  0x2a   :  { %v54_v12 = vsel %vm51_vm0, %v52_v5, %v53_v3  ;;  %74 = vrot.lane.b32.xlu1 %v56_v11, %s463_s1  ;;  %v60_v20 = vsel %vm51_vm0, %v57_v8, 0.0  ;;  %v58_v21 = vsel %vm51_vm0, %v55_v4, %v57_v8  ;;  %v336_v23 = vpack.c.bf16 %v115_v14, %v114_v10  ;;  %v119_v26 = vld [vmem:[#allocation5 + $0x38] sm:$0xff]  ;;  %v120_v30 = vld [vmem:[#allocation5 + $0x40] sm:$0xff]  ;;  %v121_v31 = vld [vmem:[#allocation5 + $0x48] sm:$0xff] }
  0x2b   :  { %72 = vrot.lane.b32.xlu0 %v54_v12, %s463_s1  ;;  %333 = vmatprep.subr.bf16.mxu0 %v332_v13  ;;  %vm61_vm1 = vcmask 1045504   ;;  %v340_v24 = vpack.c.bf16 %v117_v19, %v116_v18  ;;  %v344_v29 = vpack.c.bf16 %v119_v26, %v118_v25  ;;  %v348_v34 = vpack.c.bf16 %v121_v31, %v120_v30  ;;  %v122_v35 = vld [vmem:[#allocation5 + $0x50] sm:$0xff]  ;;  %v123_v36 = vld [vmem:[#allocation5 + $0x58] sm:$0xff]  ;;  %v124_v38 = vld [vmem:[#allocation5 + $0x60] sm:$0xff] }
  0x2c   :  { %364 = vmatprep.subr.bf16.mxu1 %v332_v13  ;;  %335 = vmatpush3.bf16.msra.mxu0 %v332_v13  ;;  %v68_v27 = vsel %vm61_vm1, %v65_v15, %v67_v16  ;;  %v64_v28 = vsel %vm61_vm1, %v62_v17, %v63_v22  ;;  %v70_v32 = vsel %vm61_vm1, %v67_v16, 0.0  ;;  %v66_v33 = vsel %vm61_vm1, %v63_v22, %v65_v15  ;;  %v125_v39 = vld [vmem:[#allocation5 + $0x68] sm:$0xff]  ;;  %v126_v41 = vld [vmem:[#allocation5 + $0x70] sm:$0xff]  ;;  %v127_v42 = vld [vmem:[#allocation5 + $0x78] sm:$0xff] }
  0x2d   :  { %372 = vmatpush3.bf16.msra.mxu1 %v332_v13  ;;  %337 = vmatprep.subr.bf16.mxu0 %v336_v23  ;;  %v352_v37 = vpack.c.bf16 %v123_v36, %v122_v35  ;;  %v356_v40 = vpack.c.bf16 %v125_v39, %v124_v38  ;;  %v360_v43 = vpack.c.bf16 %v127_v42, %v126_v41  ;;  %vm97_vm2 = vcmask 261120   ;;  %v269_v62 = vld [vmem:[%s559_s2] ss:$0 sm:$0xff]  ;;  %s465_s2 = smov [#allocation7]  }
  0x2e   :  { %365 = vmatprep.subr.bf16.mxu1 %v336_v23  ;;  %78 = vrot.lane.b32.xlu1 %v60_v20, %s463_s1  ;;  %vm102_vm3 = vcmask 523264   ;;  %vm107_vm4 = vcmask 785408   ;;  %v225_v61 = vshrl.u32 %v224_v60, 7  ;;  %s259_s13 = sshll.u32 %s465_s2, 4  ;;  %vm249_vm6 = vcmask 1041409   ;;  %s260_s13 = int_to_ptr.vmem [resolvable:$true] %s259_s13 }
  0x2f   :  { %76 = vrot.lane.b32.xlu0 %v58_v21, %s463_s1  ;;  %s431_s14 = scalar_lea.vmem %s260_s13, 32  ;;  %p436_p3 = scmp.lt.s32.totalorder %s260_s13, %s260_s13 }
  0x30   :  { %339 = vmatpush3.bf16.msra.mxu0 %v336_v23  ;;  %v226_v63 = vadd.s32 8, %v225_v61  ;;  %p432_p2 = scmp.ne.s32.totalorder %s260_s13, %s431_s14  ;;  %p437_p4 = scmp.lt.s32.totalorder %s431_s14, %s431_s14 }
  0x31   :  { %373 = vmatpush3.bf16.msra.mxu1 %v336_v23  ;;  %341 = vmatprep.subr.bf16.mxu0 %v340_v24 }
  0x32   :  { %366 = vmatprep.subr.bf16.mxu1 %v340_v24  ;;  %89 = vrot.lane.b32.xlu1 %v68_v27, %s464_s10  ;;  %vm228_vm5 = vcmp.lt.s32.totalorder %v226_v63, 14  ;;  %p438_p5 = por %p437_p4, %p436_p3 }
  0x33   :  { %85 = vrot.lane.b32.xlu0 %v64_v28, %s464_s10 }
  0x34   :  { %343 = vmatpush3.bf16.msra.mxu0 %v340_v24  ;;  %p439_p6 = pnand %p438_p5, %p432_p2 }
  0x35   :  { %374 = vmatpush3.bf16.msra.mxu1 %v340_v24  ;;  %345 = vmatprep.subr.bf16.mxu0 %v344_v29 }
  0x36   :  { %367 = vmatprep.subr.bf16.mxu1 %v344_v29  ;;  %91 = vrot.lane.b32.xlu1 %v70_v32, %s464_s10 }
  0x37   :  { %87 = vrot.lane.b32.xlu0 %v66_v33, %s464_s10 }
  0x38   :  { %347 = vmatpush3.bf16.msra.mxu0 %v344_v29 }
  0x39   :  { %375 = vmatpush3.bf16.msra.mxu1 %v344_v29  ;;  %349 = vmatprep.subr.bf16.mxu0 %v348_v34 }
  0x3a   :  { %368 = vmatprep.subr.bf16.mxu1 %v348_v34 }
  0x3c   :  { %351 = vmatpush3.bf16.msra.mxu0 %v348_v34 }
  0x3d   :  { %376 = vmatpush3.bf16.msra.mxu1 %v348_v34  ;;  %353 = vmatprep.subr.bf16.mxu0 %v352_v37 }
  0x3e   :  { %369 = vmatprep.subr.bf16.mxu1 %v352_v37 }
  0x40   :  { %355 = vmatpush3.bf16.msra.mxu0 %v352_v37 }
  0x41   :  { %377 = vmatpush3.bf16.msra.mxu1 %v352_v37  ;;  %357 = vmatprep.subr.bf16.mxu0 %v356_v40 }
  0x42   :  { %370 = vmatprep.subr.bf16.mxu1 %v356_v40 }
  0x44   :  { %359 = vmatpush3.bf16.msra.mxu0 %v356_v40 }
  0x45   :  { %378 = vmatpush3.bf16.msra.mxu1 %v356_v40  ;;  %361 = vmatprep.subr.bf16.mxu0 %v360_v43 }
  0x46   :  { %371 = vmatprep.subr.bf16.mxu1 %v360_v43 }
  0x48   :  { %363 = vmatpush3.bf16.msra.mxu0 %v360_v43 }
  0x49   :  { %379 = vmatpush3.bf16.msra.mxu1 %v360_v43 }
  0x9c   :  { %v75_v44 = vpop.permute.xlu1 %74 }
  0x9d   :  { %v73_v45 = vpop.permute.xlu0 %72  ;;  %v99_v54 = vsel %vm97_vm2, %v510_v0, %v75_v44 }
  0x9e   :  { %v98_v48 = vsel %vm97_vm2, %v514_v2, %v73_v45 }
  0xa0   :  { %v79_v46 = vpop.permute.xlu1 %78 }
  0xa1   :  { %v77_v47 = vpop.permute.xlu0 %76  ;;  %v101_v55 = vsel %vm97_vm2, %v519_v6, %v79_v46 }
  0xa2   :  { %v100_v49 = vsel %vm97_vm2, %v512_v1, %v77_v47 }
  0xa4   :  { %v90_v50 = vpop.permute.xlu1 %89 }
  0xa5   :  { %v86_v51 = vpop.permute.xlu0 %85  ;;  %v105_v53 = vsel %vm102_vm3, %v100_v49, %v90_v50 }
  0xa6   :  { %v103_v52 = vsel %vm102_vm3, %v98_v48, %v86_v51  ;;  %329 = vmatprep.mubr.msk.f32.mxu1 %vm107_vm4, %v105_v53 }
  0xa7   :  { %326 = vmatprep.mubr.msk.f32.mxu0 %vm107_vm4, %v103_v52 }
  0xa8   :  { %v92_v56 = vpop.permute.xlu1 %91 }
  0xa9   :  { %v88_v57 = vpop.permute.xlu0 %87  ;;  %v106_v58 = vsel %vm102_vm3, %v101_v55, %v92_v56 }
  0xaa   :  { %v104_v59 = vsel %vm102_vm3, %v99_v54, %v88_v57  ;;  %330 = vmatmul.mubr.msk.f32.vlgmr.msra.gmra.mrb[0].mxu1 %vm107_vm4, %v106_v58 }
  0xab   :  { %327 = vmatmul.mubr.msk.f32.vlgmr.msra.gmra.mrb[0].mxu0 %vm107_vm4, %v104_v59 }
 0x17d   :  { %v331_v2 = vpop.f32.mrb[0].mxu1 }
 0x17e   :  { %v328_v1 = vpop.f32.mrb[0].mxu0  ;;  %v217_v3 = vadd.f32 %v331_v2, %v269_v62  ;;  %v211_v5 = vpop.f32.mrb[1].mxu1 }
 0x17f   :  { %v207_v0 = vadd.f32 %v328_v1, %v269_v62  ;;  %v201_v4 = vpop.f32.mrb[1].mxu0  ;;  %v212_v7 = vadd.f32 %v269_v62, %v211_v5 }
 0x180   :  { %v202_v6 = vadd.f32 %v269_v62, %v201_v4  ;;  %v223_v9 = vmax.f32 %v217_v3, 0.0 }
 0x181   :  { %v221_v8 = vmax.f32 %v207_v0, 0.0  ;;  %v222_v11 = vmax.f32 %v212_v7, 0.0 }
 0x182   :  { %v220_v10 = vmax.f32 %v202_v6, 0.0  ;;  %v232_v13 = vsel %vm228_vm5, %v223_v9, -inf }
 0x183   :  { %v230_v12 = vsel %vm228_vm5, %v221_v8, -inf  ;;  %v240_v15 = vmax.f32 %v222_v11, %v232_v13 }
 0x184   :  { %v233_v14 = vmax.f32 %v220_v10, %v230_v12 }
 0x185   :  { %v241_v17 = vrot.slane %v240_v15, 4 }
 0x186   :  { %v234_v16 = vrot.slane %v233_v14, 4 }
 0x187   :  { %v242_v19 = vmax.f32 %v240_v15, %v241_v17 }
 0x188   :  { %v235_v18 = vmax.f32 %v233_v14, %v234_v16 }
 0x189   :  { %v243_v21 = vrot.slane %v242_v19, 2 }
 0x18a   :  { %v236_v20 = vrot.slane %v235_v18, 2 }
 0x18b   :  { %v244_v23 = vmax.f32 %v242_v19, %v243_v21 }
 0x18c   :  { %v237_v22 = vmax.f32 %v235_v18, %v236_v20 }
 0x18d   :  { %v245_v25 = vrot.slane %v244_v23, 1 }
 0x18e   :  { %v238_v24 = vrot.slane %v237_v22, 1 }
 0x18f   :  { %v246_v27 = vmax.f32 %v244_v23, %v245_v25 }
 0x190   :  { %v239_v26 = vmax.f32 %v237_v22, %v238_v24 }
 0x192   :  { %v250_v28 = vsel %vm249_vm6, %v246_v27, %v239_v26 }
 0x193   :  { %252 = vst [vmem:[#allocation7] sm:$0x3] %v250_v28 }
 0x194   :  { %442 = shalt.err (!%p439_p6)
}
 0x195   :  { %s443_s17 = scalar_lea.hbm %s560_s3, 32 }
 0x196   :  { %p444_p7 = scmp.ne.s32.totalorder %s560_s3, %s443_s17  ;;  %p447_p8 = scmp.lt.u32.totalorder %s443_s17, %s560_s3 }
 0x198   :  { %p449_p9 = pnand %p447_p8, %p444_p7 }
 0x19a   :  { %452 = shalt.err (!%p449_p9)
}
 0x19b   :  { %262 = dma.vmem_to_hbm [thread:$0]  %s260_s13, 32, %s560_s3, [#allocation4]  }
 0x19c   :  { %457 = dma.done.wait [#allocation4], 32  }
 0x19d   :  { %458 = vsyncadd [#allocation4], 4294967264 }
 0x19e   :  { %266 = vsyncpa [#allocation3], 1 }
 0x19f   :  { %267 = vsyncpa [#allocation6], 1 }
 0x1a0   :  { %268 = vsyncpa [#allocation4], 1 }

</bundles_post_ra>
